<compile_context>
chip_gen: v7x
topology: tpu7x:2x2x1
jax: 0.10.0
libtpu: 0.0.40
codegen_flags: <defaults>
</compile_context>

<pallas_src>
import math
import functools

import jax
import jax.numpy as jnp
import numpy as np
from jax.experimental import pallas as pl
from jax.experimental.pallas import tpu as pltpu

_LANES = 128


def _round_up(x, m):
    return -(-x // m) * m


def _mse_bpr_kernel(cols_ref, rows_ref, out_ref, acc_ref, *,
                    alpha1, alpha2, exp_weighted, bf16_exp):
    j = pl.program_id(1)

    @pl.when(j == 0)
    def _():
        acc_ref[...] = jnp.zeros_like(acc_ref)

    xi = cols_ref[:, 0:1]                      # (TM, 1)   input[i]
    ti = cols_ref[:, 1:2]                      # (TM, 1)   target[i]  (+inf pad)
    xj = rows_ref[0:1, :]                      # (1, TN)   input[j]
    tj = rows_ref[1:2, :]                      # (1, TN)   target[j]  (-inf pad)

    # pair selection target[j] > target[i]; sentinel padding makes this False
    # for every padded row/column, so no iota validity masks are needed.
    mask = tj > ti                             # (TM, TN)

    # alpha1 * log(1 + exp(-(x_j - x_i))) == softplus(x_i - x_j)
    # single-exp stable form: max(d, 0) + log1p(exp(-|d|))
    d = xi - xj                                # (TM, TN)
    nad = -jnp.abs(d)
    if bf16_exp:
        # v6e/v7x bf16 EUP: ~2x exp throughput; cast back to f32 for log1p.
        e = jnp.exp(nad.astype(jnp.bfloat16)).astype(jnp.float32)
    else:
        e = jnp.exp(nad)
    softplus = jnp.maximum(d, 0.0) + jnp.log1p(e)

    mse_i = alpha2 * (xi - ti) ** 2            # (TM, 1), broadcast over lanes
    pair = alpha1 * softplus + mse_i           # (TM, TN)

    nonneg = (alpha1 >= 0.0) and (alpha2 >= 0.0)   # static (trace time)

    if not exp_weighted:
        keep = mask if nonneg else (mask & (pair > 0.0))
        pair = jnp.where(keep, pair, 0.0)
        acc_ref[...] += jnp.sum(pair, axis=-1, keepdims=True)
    elif nonneg:
        # pair >= 0, so sign(w_i*w_j*pair) == sign(w_i*w_j) and the relu keeps
        # exactly the pairs where sign(t_i) == sign(t_j).  w_j is applied in
        # the lane reduction; w_i once per row at the very end.
        wj = rows_ref[2:3, :]                  # (1, TN)  exp(t_j)-1 (0 on pad)
        keep = mask & ((ti > 0.0) == (tj > 0.0))
        pair = jnp.where(keep, pair, 0.0)
        acc_ref[...] += jnp.sum(pair * wj, axis=-1, keepdims=True)
    else:
        # general exp-weighted case (a negative alpha): the relu depends on the
        # sign of the full product, so keep the per-pair multiply.
        wi = cols_ref[:, 2:3]                  # (TM, 1)
        wj = rows_ref[2:3, :]                  # (1, TN)
        pair = (wi * wj) * pair
        keep = mask & (pair > 0.0)
        pair = jnp.where(keep, pair, 0.0)
        acc_ref[...] += jnp.sum(pair, axis=-1, keepdims=True)

    @pl.when(j == pl.num_programs(1) - 1)
    def _():
        rowsum = acc_ref[...]                  # (TM, 1)
        if exp_weighted and nonneg:
            rowsum = rowsum * cols_ref[:, 2:3]     # w_i (0 on padded rows)
        s = jnp.sum(rowsum, keepdims=True)         # (1, 1)
        lane = jax.lax.broadcasted_iota(jnp.int32, (1, _LANES), 1)
        out_ref[...] = jnp.where(lane == 0, s, 0.0)


def mse_bpr_loss(inp, target, *, exp_weighted=False, alpha1=0.5, alpha2=0.5,
                 tile_m=128, tile_n=256, bf16_exp=False):
    """Pallas implementation of MSEBPRLoss.forward for 1-D input/target."""
    assert inp.ndim == 1 and target.shape == inp.shape
    n = inp.shape[0]

    # i (sublane) axis: tile of TM rows (multiple of 8), padded to num_i * TM.
    tm = min(int(tile_m), _round_up(n, 8))
    tm = max(8, (tm // 8) * 8)
    npad_i = _round_up(n, tm)
    num_i = npad_i // tm
    # j (lane) axis: tile of TN lanes (multiple of 128), padded to num_j * TN.
    tn = max(_LANES, min(_round_up(int(tile_n), _LANES), _round_up(n, _LANES)))
    npad_j = _round_up(n, tn)
    num_j = npad_j // tn

    x32 = inp.astype(jnp.float32)
    t32 = target.astype(jnp.float32)
    w32 = (jnp.exp(t32) - 1.0) if exp_weighted else jnp.ones_like(t32)  # O(N)

    pinf = float("inf")
    # i-side slab: [input, target(+inf pad), w_i(0 pad)], gridded over i.
    cols = jnp.stack([
        jnp.pad(x32, (0, npad_i - n)),
        jnp.pad(t32, (0, npad_i - n), constant_values=pinf),
        jnp.pad(w32, (0, npad_i - n)),
    ], axis=1)                                             # (npad_i, 3)
    # j-side slab: [input, target(-inf pad), w_j(0 pad)], gridded over j.
    rows = jnp.stack([
        jnp.pad(x32, (0, npad_j - n)),
        jnp.pad(t32, (0, npad_j - n), constant_values=-pinf),
        jnp.pad(w32, (0, npad_j - n)),
    ], axis=0)                                             # (3, npad_j)

    kernel = functools.partial(
        _mse_bpr_kernel, alpha1=float(alpha1), alpha2=float(alpha2),
        exp_weighted=bool(exp_weighted), bf16_exp=bool(bf16_exp))

    pairs = npad_i * npad_j
    cost = pl.CostEstimate(
        flops=12 * pairs,
        transcendentals=2 * pairs,                 # exp + log1p per pair
        bytes_accessed=(3 * npad_i + 3 * npad_j * num_i + num_i * _LANES) * 4)

    partials = pl.pallas_call(
        kernel,
        out_shape=jax.ShapeDtypeStruct((1, num_i * _LANES), jnp.float32),
        grid=(num_i, num_j),                       # j (reduction) innermost
        in_specs=[
            pl.BlockSpec((tm, 3), lambda i, j: (i, 0)),   # i-chunk (rows of pairs)
            pl.BlockSpec((3, tn), lambda i, j: (0, j)),   # j-chunk (lanes)
        ],
        out_specs=pl.BlockSpec((1, _LANES), lambda i, j: (0, i)),
        scratch_shapes=[pltpu.VMEM((tm, 1), jnp.float32)],  # per-row accumulator
        compiler_params=pltpu.CompilerParams(
            dimension_semantics=("parallel", "arbitrary"),
            vmem_limit_bytes=32 * 1024 * 1024),
        cost_estimate=cost,
    )(cols, rows)

    total = jnp.sum(partials)

    if exp_weighted:
        scale = 2.0 / (n * (math.e - 1.0)) ** 2
    else:
        scale = 2.0 / n ** 2
    return scale * total


def _reference_numpy(inp, target, exp_weighted=False, alpha1=0.5, alpha2=0.5):
    """Direct port of the PyTorch loop semantics for verification."""
    inp = np.asarray(inp, np.float64)
    target = np.asarray(target, np.float64)
    n = inp.shape[0]
    total = 0.0
    for i in range(n):
        idx = target > target[i]
        x = alpha1 * np.log(1.0 + np.exp(-(inp[idx] - inp[i]))) \
            + alpha2 * (inp[i] - target[i]) ** 2
        if exp_weighted:
            x = (np.exp(target[i]) - 1.0) * (np.exp(target[idx]) - 1.0) * x
        x = np.where(x < 0.0, 0.0, x)
        total += np.sum(x)
    if exp_weighted:
        return 2.0 / (n * (math.e - 1.0)) ** 2 * total
    return 2.0 / n ** 2 * total


if __name__ == "__main__":
    key = jax.random.PRNGKey(0)
    k1, k2, k3, k4, k5, k6 = jax.random.split(key, 6)

    def check(inp, tgt, rtol=1e-4, atol=1e-5, **kw):
        loss = jax.block_until_ready(mse_bpr_loss(inp, tgt, **kw))
        ref = _reference_numpy(np.asarray(inp), np.asarray(tgt),
                               exp_weighted=kw.get("exp_weighted", False),
                               alpha1=kw.get("alpha1", 0.5),
                               alpha2=kw.get("alpha2", 0.5))
        np.testing.assert_allclose(float(loss), ref, rtol=rtol, atol=atol)

    # lane-aligned case (single tile), both branches
    n1 = 128
    inp1 = jax.random.normal(k1, (n1,), dtype=jnp.float32)
    tgt1 = jax.random.uniform(k2, (n1,), dtype=jnp.float32)
    check(inp1, tgt1, exp_weighted=False)
    check(inp1, tgt1, exp_weighted=True)

    # unaligned case: exercises sentinel padding and a 2-tile i grid
    n2 = 200
    inp2 = jax.random.normal(k3, (n2,), dtype=jnp.float32)
    tgt2 = jax.random.uniform(k4, (n2,), dtype=jnp.float32)
    check(inp2, tgt2, exp_weighted=False)

    # multi-tile on BOTH axes (3 i-tiles x 2 j-tiles), mixed-sign targets
    # (exercises the j accumulator and the sign-test form of the weighted relu)
    n3 = 300
    inp3 = jax.random.normal(k5, (n3,), dtype=jnp.float32)
    tgt3 = jax.random.normal(k6, (n3,), dtype=jnp.float32)
    check(inp3, tgt3, exp_weighted=True)
    # general exp-weighted path (negative alpha -> per-pair product + relu)
    check(inp3, tgt3, exp_weighted=True, alpha1=-0.25)
    # bf16-EUP exp variant (v6e/v7x optimization), looser tolerance
    check(inp3, tgt3, exp_weighted=False, bf16_exp=True, rtol=2e-2, atol=1e-4)

    print("KERNEL_OK")
</pallas_src>

<mosaic_0001>
module attributes {stable_mosaic.version = 11 : i64} {
  func.func @_mse_bpr_kernel(%arg0: i32, %arg1: i32, %arg2: memref<128x3xf32, #tpu.memory_space<vmem>>, %arg3: memref<3x128xf32, #tpu.memory_space<vmem>>, %arg4: memref<1x128xf32, #tpu.memory_space<vmem>>, %arg5: memref<128x1xf32, #tpu.memory_space<vmem>>) attributes {dimension_semantics = [#tpu.dimension_semantics<parallel>, #tpu.dimension_semantics<arbitrary>], iteration_bounds = array<i64: 1, 1>, scalar_prefetch = 0 : i64, scratch_operands = 1 : i64, tpu.core_type = #tpu.core_type<tc>, window_params = [{transform_indices = @transform_0, window_bounds = array<i64: 128, 3>}, {transform_indices = @transform_1, window_bounds = array<i64: 3, 128>}, {transform_indices = @transform_2, window_bounds = array<i64: 1, 128>}]} {
    %c0_i32 = arith.constant 0 : i32
    %0 = arith.cmpi eq, %arg1, %c0_i32 : i32
    %1 = arith.extui %0 : i1 to i32
    %c0_i32_0 = arith.constant 0 : i32
    %2 = arith.cmpi ne, %1, %c0_i32_0 : i32
    scf.if %2 {
      %cst_18 = arith.constant 0.000000e+00 : f32
      %39 = vector.broadcast %cst_18 : f32 to vector<128x1xf32>
      %c0_19 = arith.constant 0 : index
      %c0_20 = arith.constant 0 : index
      %40 = vector.load %arg5[%c0_19, %c0_20] : memref<128x1xf32, #tpu.memory_space<vmem>>, vector<128x1xf32>
      tpu.vector_store %arg5[%c0_19, %c0_20], %39 {strides = array<i32>} : memref<128x1xf32, #tpu.memory_space<vmem>>, vector<128x1xf32>,
    } else {
    }
    %c0 = arith.constant 0 : index
    %c0_1 = arith.constant 0 : index
    %3 = vector.load %arg2[%c0, %c0_1] : memref<128x3xf32, #tpu.memory_space<vmem>>, vector<128x1xf32>
    %c0_2 = arith.constant 0 : index
    %c1 = arith.constant 1 : index
    %4 = vector.load %arg2[%c0_2, %c1] : memref<128x3xf32, #tpu.memory_space<vmem>>, vector<128x1xf32>
    %c0_3 = arith.constant 0 : index
    %c0_4 = arith.constant 0 : index
    %5 = vector.load %arg3[%c0_3, %c0_4] : memref<3x128xf32, #tpu.memory_space<vmem>>, vector<1x128xf32>
    %c1_5 = arith.constant 1 : index
    %c0_6 = arith.constant 0 : index
    %6 = vector.load %arg3[%c1_5, %c0_6] : memref<3x128xf32, #tpu.memory_space<vmem>>, vector<1x128xf32>
    %7 = vector.broadcast %6 : vector<1x128xf32> to vector<128x128xf32>
    %8 = vector.broadcast %4 : vector<128x1xf32> to vector<128x128xf32>
    %9 = arith.cmpf ogt, %7, %8 : vector<128x128xf32>
    %10 = vector.broadcast %3 : vector<128x1xf32> to vector<128x128xf32>
    %11 = vector.broadcast %5 : vector<1x128xf32> to vector<128x128xf32>
    %12 = arith.subf %10, %11 : vector<128x128xf32>
    %13 = math.absf %12 : vector<128x128xf32>
    %cst = arith.constant 0.000000e+00 : f32
    %14 = vector.broadcast %cst : f32 to vector<128x128xf32>
    %15 = arith.subf %14, %13 : vector<128x128xf32>
    %16 = math.exp %15 : vector<128x128xf32>
    %cst_7 = arith.constant 0.000000e+00 : f32
    %17 = vector.broadcast %cst_7 : f32 to vector<128x128xf32>
    %18 = arith.maximumf %12, %17 : vector<128x128xf32>
    %19 = math.log1p %16 : vector<128x128xf32>
    %20 = arith.addf %18, %19 : vector<128x128xf32>
    %21 = arith.subf %3, %4 : vector<128x1xf32>
    %22 = arith.mulf %21, %21 : vector<128x1xf32>
    %cst_8 = arith.constant 5.000000e-01 : f32
    %23 = vector.broadcast %cst_8 : f32 to vector<128x1xf32>
    %24 = arith.mulf %23, %22 : vector<128x1xf32>
    %cst_9 = arith.constant 5.000000e-01 : f32
    %25 = vector.broadcast %cst_9 : f32 to vector<128x128xf32>
    %26 = arith.mulf %25, %20 : vector<128x128xf32>
    %27 = vector.broadcast %24 : vector<128x1xf32> to vector<128x128xf32>
    %28 = arith.addf %26, %27 : vector<128x128xf32>
    %cst_10 = arith.constant 0.000000e+00 : f32
    %29 = vector.broadcast %cst_10 : f32 to vector<128x128xf32>
    %30 = arith.select %9, %28, %29 : vector<128x128xi1>, vector<128x128xf32>
    %c0_11 = arith.constant 0 : index
    %c0_12 = arith.constant 0 : index
    %31 = vector.load %arg5[%c0_11, %c0_12] : memref<128x1xf32, #tpu.memory_space<vmem>>, vector<128x1xf32>
    %cst_13 = arith.constant dense<0.000000e+00> : vector<128xf32>
    %32 = vector.multi_reduction <add>, %30, %cst_13 [1] : vector<128x128xf32> to vector<128xf32>
    %33 = vector.shape_cast %32 : vector<128xf32> to vector<128x1xf32>
    %34 = arith.addf %31, %33 : vector<128x1xf32>
    %c0_14 = arith.constant 0 : index
    %c0_15 = arith.constant 0 : index
    %35 = vector.load %arg5[%c0_14, %c0_15] : memref<128x1xf32, #tpu.memory_space<vmem>>, vector<128x1xf32>
    tpu.vector_store %arg5[%c0_14, %c0_15], %34 {strides = array<i32>} : memref<128x1xf32, #tpu.memory_space<vmem>>, vector<128x1xf32>,
    %c0_i32_16 = arith.constant 0 : i32
    %36 = arith.cmpi eq, %arg1, %c0_i32_16 : i32
    %37 = arith.extui %36 : i1 to i32
    %c0_i32_17 = arith.constant 0 : i32
    %38 = arith.cmpi ne, %37, %c0_i32_17 : i32
    scf.if %38 {
      %c0_18 = arith.constant 0 : index
      %c0_19 = arith.constant 0 : index
      %39 = vector.load %arg5[%c0_18, %c0_19] : memref<128x1xf32, #tpu.memory_space<vmem>>, vector<128x1xf32>
      %40 = vector.shape_cast %39 : vector<128x1xf32> to vector<1x128x1xf32>
      %cst_20 = arith.constant dense<0.000000e+00> : vector<1xf32>
      %41 = vector.multi_reduction <add>, %40, %cst_20 [1, 2] : vector<1x128x1xf32> to vector<1xf32>
      %42 = vector.shape_cast %41 : vector<1xf32> to vector<1x1x1xf32>
      %43 = vector.extract %42[0, 0, 0] : f32 from vector<1x1x1xf32>
      %44 = vector.broadcast %43 : f32 to vector<1x1xf32>
      %45 = tpu.iota {dimensions = array<i32: 1>} : vector<1x128xi32>
      %c0_i32_21 = arith.constant 0 : i32
      %46 = vector.broadcast %c0_i32_21 : i32 to vector<1x128xi32>
      %47 = arith.cmpi eq, %45, %46 : vector<1x128xi32>
      %cst_22 = arith.constant 0.000000e+00 : f32
      %48 = vector.shape_cast %44 : vector<1x1xf32> to vector<1x1xf32>
      %49 = vector.broadcast %48 : vector<1x1xf32> to vector<1x128xf32>
      %50 = vector.broadcast %cst_22 : f32 to vector<1x128xf32>
      %51 = arith.select %47, %49, %50 : vector<1x128xi1>, vector<1x128xf32>
      %c0_23 = arith.constant 0 : index
      %c0_24 = arith.constant 0 : index
      %52 = vector.load %arg4[%c0_23, %c0_24] : memref<1x128xf32, #tpu.memory_space<vmem>>, vector<1x128xf32>
      tpu.vector_store %arg4[%c0_23, %c0_24], %51 {strides = array<i32>} : memref<1x128xf32, #tpu.memory_space<vmem>>, vector<1x128xf32>,
    } else {
    }
    return
  }
  func.func @transform_0(%arg0: i32, %arg1: i32) -> (i32, i32) {
    %c0_i32 = arith.constant 0 : i32
    %c0_i32_0 = arith.constant 0 : i32
    return %arg0, %c0_i32 : i32, i32
  }
  func.func @transform_1(%arg0: i32, %arg1: i32) -> (i32, i32) {
    %c0_i32 = arith.constant 0 : i32
    %c0_i32_0 = arith.constant 0 : i32
    return %c0_i32, %arg1 : i32, i32
  }
  func.func @transform_2(%arg0: i32, %arg1: i32) -> (i32, i32) {
    %c0_i32 = arith.constant 0 : i32
    %c0_i32_0 = arith.constant 0 : i32
    return %c0_i32, %arg0 : i32, i32
  }
}

</mosaic_0001>

<bundles_post_ra>
// kernel: tpu_custom_call.1
= control target key start
LH: loop header
LB: loop body
LE: loop exit
PB: predicated region body
PF: predicated region fallthrough
CT: control target
= control target key end

     0   :  { %s966_s13 = smov 127   ;;  %v967_v4 = vmov 0   ;;  %v968_v5 = vmov 1   ;;  %s1569_s0 = inlined_call_operand.vmem [shape: f32[128,3], index: 0, kind: input, shape index: {}]   ;;  %s1570_s1 = inlined_call_operand.vmem [shape: f32[3,128], index: 1, kind: input, shape index: {}]   ;;  %s1571_s2 = inlined_call_operand.hbm [shape: f32[1,128], index: 2, kind: output, shape index: {}]  }
   0x1   :  { %v989_v0 = vld [vmem:[%s1569_s0 + $0x10] sm:$0xff]  ;;  %v994_v1 = vld [vmem:[%s1569_s0] sm:$0xff]  ;;  %v1003_v2 = vld [vmem:[%s1569_s0 + $0x18] sm:$0xff]  ;;  %868 = vset.pattern.permute.xlu1 %v967_v4  ;;  %870 = vset.pattern.permute.xlu0 %v968_v5 }
   0x2   :  { %479 = vrot.lane.b32.xlu1 %v989_v0, %s966_s13  ;;  %475 = vrot.lane.b32.xlu0 %v994_v1, %s966_s13  ;;  %v1008_v3 = vld [vmem:[%s1569_s0 + $0x8] sm:$0xff]  ;;  %v1024_v7 = vld [vmem:[%s1569_s0 + $0x20] sm:$0xff] }
   0x3   :  { %v1019_v6 = vld [vmem:[%s1569_s0 + $0x28] sm:$0xff] }
   0x6   :  { %481 = vrot.lane.b32.xlu1 %v1003_v2, %s966_s13  ;;  %477 = vrot.lane.b32.xlu0 %v1008_v3, %s966_s13 }
   0x7   :  { %7 = vsyncpa [#allocation4], 0  ;;  %v1033_v8 = vld [vmem:[%s1569_s0 + $0x38] sm:$0xff]  ;;  %v1038_v9 = vld [vmem:[%s1569_s0 + $0x30] sm:$0xff] }
   0x8   :  { %v1047_v10 = vld [vmem:[%s1569_s0 + $0x48] sm:$0xff]  ;;  %v1052_v11 = vld [vmem:[%s1569_s0 + $0x40] sm:$0xff]  ;;  %v1061_v12 = vld [vmem:[%s1569_s0 + $0x58] sm:$0xff] }
   0x9   :  { %v1066_v13 = vld [vmem:[%s1569_s0 + $0x50] sm:$0xff]  ;;  %v1075_v14 = vld [vmem:[%s1569_s0 + $0x68] sm:$0xff]  ;;  %v1080_v15 = vld [vmem:[%s1569_s0 + $0x60] sm:$0xff] }
   0xa   :  { %485 = vrot.lane.b32.xlu1 %v1019_v6, %s966_s13  ;;  %483 = vrot.lane.b32.xlu0 %v1024_v7, %s966_s13  ;;  %v1091_v16 = vld [vmem:[%s1569_s0 + $0x70] sm:$0xff]  ;;  %v1099_v17 = vld [vmem:[%s1569_s0 + $0x78] sm:$0xff] }
   0xe   :  { %489 = vrot.lane.b32.xlu1 %v1033_v8, %s966_s13  ;;  %487 = vrot.lane.b32.xlu0 %v1038_v9, %s966_s13 }
  0x12   :  { %493 = vrot.lane.b32.xlu1 %v1047_v10, %s966_s13  ;;  %491 = vrot.lane.b32.xlu0 %v1052_v11, %s966_s13 }
  0x16   :  { %497 = vrot.lane.b32.xlu1 %v1061_v12, %s966_s13  ;;  %495 = vrot.lane.b32.xlu0 %v1066_v13, %s966_s13 }
  0x1a   :  { %501 = vrot.lane.b32.xlu1 %v1075_v14, %s966_s13  ;;  %499 = vrot.lane.b32.xlu0 %v1080_v15, %s966_s13 }
  0x1e   :  { %156 = vperm.xlu1 %868, %v1008_v3   ;;  %62 = vperm.xlu0 %870, %v1008_v3  }
  0x22   :  { %503 = vrot.lane.b32.xlu1 %v1091_v16, %s966_s13  ;;  %77 = vperm.xlu0 %870, %v1024_v7  }
  0x26   :  { %505 = vrot.lane.b32.xlu1 %v1099_v17, %s966_s13  ;;  %92 = vperm.xlu0 %870, %v1033_v8  }
  0x2a   :  { %168 = vperm.xlu1 %868, %v1024_v7   ;;  %107 = vperm.xlu0 %870, %v1066_v13  }
  0x2e   :  { %176 = vperm.xlu1 %868, %v1038_v9   ;;  %871 = vset.pattern.permute.xlu0 %v967_v4 }
  0x2f   :  { %152 = vperm.xlu0 %871, %v994_v1  }
  0x32   :  { %184 = vperm.xlu1 %868, %v1052_v11  }
  0x33   :  { %160 = vperm.xlu0 %871, %v989_v0  }
  0x36   :  { %192 = vperm.xlu1 %868, %v1066_v13  }
  0x37   :  { %164 = vperm.xlu0 %871, %v1003_v2  }
  0x3a   :  { %200 = vperm.xlu1 %868, %v1080_v15  }
  0x3b   :  { %172 = vperm.xlu0 %871, %v1019_v6  }
  0x3e   :  { %208 = vperm.xlu1 %868, %v1091_v16  }
  0x3f   :  { %180 = vperm.xlu0 %871, %v1033_v8  }
  0x42   :  { %869 = vset.pattern.permute.xlu1 %v968_v5 }
  0x43   :  { %188 = vperm.xlu0 %871, %v1047_v10   ;;  %57 = vperm.xlu1 %869, %v994_v1  }
  0x47   :  { %196 = vperm.xlu0 %871, %v1061_v12   ;;  %67 = vperm.xlu1 %869, %v989_v0  }
  0x4b   :  { %204 = vperm.xlu0 %871, %v1075_v14   ;;  %72 = vperm.xlu1 %869, %v1003_v2  }
  0x4f   :  { %212 = vperm.xlu0 %871, %v1099_v17   ;;  %82 = vperm.xlu1 %869, %v1019_v6  }
  0x53   :  { %87 = vperm.xlu1 %869, %v1038_v9  }
  0x57   :  { %97 = vperm.xlu1 %869, %v1052_v11  }
  0x5b   :  { %102 = vperm.xlu1 %869, %v1047_v10  }
  0x5f   :  { %872 = vset.pattern.permute.xlu1 %v967_v4 }
  0x74   :  { %v476_v18 = vpop.permute.xlu0 %475  ;;  %v480_v19 = vpop.permute.xlu1 %479 }
  0x75   :  { %v523_v20 = vsub.f32 %v994_v1, %v476_v18  ;;  %v525_v21 = vsub.f32 %v989_v0, %v480_v19 }
  0x77   :  { %v539_v22 = vmul.f32 %v523_v20, %v523_v20  ;;  %v541_v23 = vmul.f32 %v525_v21, %v525_v21 }
  0x78   :  { %v478_v24 = vpop.permute.xlu0 %477  ;;  %v482_v25 = vpop.permute.xlu1 %481 }
  0x79   :  { %v555_v26 = vmul.f32 0.5, %v539_v22  ;;  %v524_v27 = vsub.f32 %v1008_v3, %v478_v24  ;;  %v526_v28 = vsub.f32 %v1003_v2, %v482_v25  ;;  %v557_v30 = vmul.f32 0.5, %v541_v23 }
  0x7b   :  { %v540_v29 = vmul.f32 %v524_v27, %v524_v27  ;;  %589 = vperm.xlu1 %872, %v555_v26   ;;  %v542_v34 = vmul.f32 %v526_v28, %v526_v28 }
  0x7c   :  { %v484_v31 = vpop.permute.xlu0 %483  ;;  %v486_v32 = vpop.permute.xlu1 %485 }
  0x7d   :  { %v556_v33 = vmul.f32 0.5, %v540_v29  ;;  %v527_v35 = vsub.f32 %v1024_v7, %v484_v31  ;;  %v528_v36 = vsub.f32 %v1019_v6, %v486_v32  ;;  %v558_v40 = vmul.f32 0.5, %v542_v34 }
  0x7f   :  { %v543_v37 = vmul.f32 %v527_v35, %v527_v35  ;;  %599 = vperm.xlu1 %872, %v557_v30   ;;  %594 = vperm.xlu0 %871, %v556_v33   ;;  %v544_v42 = vmul.f32 %v528_v36, %v528_v36 }
  0x80   :  { %v490_v38 = vpop.permute.xlu1 %489  ;;  %v488_v39 = vpop.permute.xlu0 %487 }
  0x81   :  { %v559_v41 = vmul.f32 0.5, %v543_v37  ;;  %v530_v43 = vsub.f32 %v1033_v8, %v490_v38  ;;  %v529_v44 = vsub.f32 %v1038_v9, %v488_v39  ;;  %v560_v47 = vmul.f32 0.5, %v544_v42 }
  0x83   :  { %604 = vperm.xlu0 %871, %v558_v40   ;;  %609 = vperm.xlu1 %872, %v559_v41   ;;  %v546_v48 = vmul.f32 %v530_v43, %v530_v43  ;;  %v545_v50 = vmul.f32 %v529_v44, %v529_v44 }
  0x84   :  { %v494_v45 = vpop.permute.xlu1 %493  ;;  %v492_v46 = vpop.permute.xlu0 %491 }
  0x85   :  { %v531_v49 = vsub.f32 %v1052_v11, %v492_v46  ;;  %v532_v51 = vsub.f32 %v1047_v10, %v494_v45  ;;  %v562_v54 = vmul.f32 0.5, %v546_v48  ;;  %v561_v57 = vmul.f32 0.5, %v545_v50 }
  0x87   :  { %v547_v52 = vmul.f32 %v531_v49, %v531_v49  ;;  %875 = vset.pattern.permute.xlu0 %v968_v5  ;;  %614 = vperm.xlu1 %872, %v560_v47   ;;  %v548_v58 = vmul.f32 %v532_v51, %v532_v51 }
  0x88   :  { %122 = vperm.xlu0 %875, %v1075_v14   ;;  %v496_v53 = vpop.permute.xlu0 %495  ;;  %v498_v56 = vpop.permute.xlu1 %497 }
  0x89   :  { %v533_v55 = vsub.f32 %v1066_v13, %v496_v53  ;;  %v563_v59 = vmul.f32 0.5, %v547_v52  ;;  %v534_v62 = vsub.f32 %v1061_v12, %v498_v56  ;;  %v564_v0 = vmul.f32 0.5, %v548_v58 }
  0x8b   :  { %v549_v60 = vmul.f32 %v533_v55, %v533_v55  ;;  %624 = vperm.xlu1 %872, %v562_v54   ;;  %v550_v3 = vmul.f32 %v534_v62, %v534_v62 }
  0x8c   :  { %876 = vset.pattern.permute.xlu0 %v967_v4  ;;  %v500_v61 = vpop.permute.xlu0 %499  ;;  %v502_v8 = vpop.permute.xlu1 %501 }
  0x8d   :  { %619 = vperm.xlu0 %876, %v561_v57   ;;  %v535_v63 = vsub.f32 %v1080_v15, %v500_v61  ;;  %v565_v1 = vmul.f32 0.5, %v549_v60  ;;  %v566_v7 = vmul.f32 0.5, %v550_v3  ;;  %v536_v9 = vsub.f32 %v1075_v14, %v502_v8 }
  0x8f   :  { %v551_v2 = vmul.f32 %v535_v63, %v535_v63  ;;  %629 = vperm.xlu1 %872, %v563_v59   ;;  %v552_v13 = vmul.f32 %v536_v9, %v536_v9 }
  0x91   :  { %v567_v6 = vmul.f32 0.5, %v551_v2  ;;  %634 = vperm.xlu0 %876, %v564_v0   ;;  %v568_v20 = vmul.f32 0.5, %v552_v13 }
  0x93   :  { %639 = vperm.xlu1 %872, %v565_v1  }
  0x95   :  { %649 = vperm.xlu0 %876, %v567_v6  }
  0x97   :  { %644 = vperm.xlu1 %872, %v566_v7  }
  0x9b   :  { %873 = vset.pattern.permute.xlu1 %v968_v5 }
  0x9c   :  { %112 = vperm.xlu1 %873, %v1061_v12  }
  0x9d   :  { %v157_v10 = vpop.permute.xlu1 %156  ;;  %v1149_v11 = vpop.permute.xlu0 %62 }
  0xa0   :  { %117 = vperm.xlu1 %873, %v1080_v15  }
  0xa1   :  { %v504_v18 = vpop.permute.xlu1 %503  ;;  %v1153_v22 = vpop.permute.xlu0 %77 }
  0xa2   :  { %v537_v19 = vsub.f32 %v1091_v16, %v504_v18 }
  0xa4   :  { %v553_v21 = vmul.f32 %v537_v19, %v537_v19  ;;  %874 = vset.pattern.permute.xlu1 %v967_v4  ;;  %v1166_v4 = vld [vmem:[%s1570_s1] ss:$0 sm:$0xff] }
  0xa5   :  { %v506_v14 = vpop.permute.xlu1 %505  ;;  %654 = vperm.xlu1 %874, %v568_v20   ;;  %v1157_v26 = vpop.permute.xlu0 %92  ;;  %v1170_v28 = vsub.f32 %v157_v10, %v1166_v4 }
  0xa6   :  { %v569_v23 = vmul.f32 0.5, %v553_v21  ;;  %v538_v12 = vsub.f32 %v1099_v17, %v506_v14 }
  0xa7   :  { %v236_v31 = vand.u32 2147483647, %v1170_v28 }
  0xa8   :  { %v554_v24 = vmul.f32 %v538_v12, %v538_v12 }
  0xa9   :  { %659 = vperm.xlu1 %874, %v569_v23   ;;  %v169_v15 = vpop.permute.xlu1 %168  ;;  %v1161_v27 = vpop.permute.xlu0 %107 }
  0xaa   :  { %v570_v25 = vmul.f32 0.5, %v554_v24  ;;  %v1181_v38 = vsub.f32 %v169_v15, %v1166_v4 }
  0xac   :  { %664 = vperm.xlu0 %876, %v570_v25   ;;  %v239_v42 = vand.u32 2147483647, %v1181_v38 }
  0xad   :  { %877 = vset.pattern.permute.xlu1 %v968_v5  ;;  %v177_v29 = vpop.permute.xlu1 %176  ;;  %v252_v5 = vsub.f32 0.0, %v236_v31 }
  0xae   :  { %127 = vperm.xlu1 %877, %v1091_v16   ;;  %v153_v30 = vpop.permute.xlu0 %152  ;;  %v255_v49 = vsub.f32 0.0, %v239_v42  ;;  %v1199_v58 = vsub.f32 %v177_v29, %v1166_v4 }
  0xaf   :  { %v1174_v33 = vsub.f32 %v153_v30, %v1166_v4  ;;  %v269_v34 = vmul.f32 1.442695, %v252_v5 }
  0xb0   :  { %v275_v57 = vmul.f32 1.442695, %v255_v49  ;;  %v241_v1 = vand.u32 2147483647, %v1199_v58  ;;  %v303_v49 = vmax.f32 %v1181_v38, 0.0 }
  0xb1   :  { %v185_v32 = vpop.permute.xlu1 %184  ;;  %v235_v37 = vand.u32 2147483647, %v1174_v33  ;;  %878 = vpow2.f32 %v269_v34 }
  0xb2   :  { %132 = vperm.xlu1 %877, %v1099_v17   ;;  %v161_v16 = vpop.permute.xlu0 %160  ;;  %v1203_v61 = vsub.f32 %v185_v32, %v1166_v4  ;;  %v257_v18 = vsub.f32 0.0, %v241_v1 }
  0xb3   :  { %v1178_v17 = vsub.f32 %v161_v16, %v1166_v4  ;;  %v251_v39 = vsub.f32 0.0, %v235_v37 }
  0xb4   :  { %v243_v6 = vand.u32 2147483647, %v1203_v61  ;;  %v279_v29 = vmul.f32 1.442695, %v257_v18 }
  0xb5   :  { %v193_v35 = vpop.permute.xlu1 %192  ;;  %v237_v40 = vand.u32 2147483647, %v1178_v17  ;;  %v267_v46 = vmul.f32 1.442695, %v251_v39  ;;  %v300_v39 = vmax.f32 %v1170_v28, 0.0 }
  0xb6   :  { %v165_v36 = vpop.permute.xlu0 %164  ;;  %v1214_v8 = vsub.f32 %v193_v35, %v1166_v4  ;;  %v259_v19 = vsub.f32 0.0, %v243_v6 }
  0xb7   :  { %v1185_v41 = vsub.f32 %v165_v36, %v1166_v4  ;;  %v253_v47 = vsub.f32 0.0, %v237_v40  ;;  %880 = vpow2.f32 %v267_v46 }
  0xb8   :  { %v245_v21 = vand.u32 2147483647, %v1214_v8  ;;  %v283_v5 = vmul.f32 1.442695, %v259_v19 }
  0xb9   :  { %v201_v43 = vpop.permute.xlu1 %200  ;;  %v238_v48 = vand.u32 2147483647, %v1185_v41  ;;  %v271_v54 = vmul.f32 1.442695, %v253_v47 }
  0xba   :  { %v173_v44 = vpop.permute.xlu0 %172  ;;  %v1223_v14 = vsub.f32 %v201_v43, %v1166_v4  ;;  %v261_v35 = vsub.f32 0.0, %v245_v21 }
  0xbb   :  { %v1189_v45 = vsub.f32 %v173_v44, %v1166_v4  ;;  %v1193_v51 = vpop.eup %878  ;;  %v254_v55 = vsub.f32 0.0, %v238_v48  ;;  %882 = vpow2.f32 %v271_v54 }
  0xbc   :  { %v324_v60 = vadd.f32 1.0, %v1193_v51  ;;  %884 = vpow2.f32 %v275_v57  ;;  %v327_v25 = vmul.f32 -0.5, %v1193_v51  ;;  %v247_v36 = vand.u32 2147483647, %v1223_v14 }
  0xbd   :  { %v240_v50 = vand.u32 2147483647, %v1189_v45  ;;  %v209_v52 = vpop.permute.xlu1 %208  ;;  %v273_v63 = vmul.f32 1.442695, %v254_v55  ;;  %v330_v47 = vand.u32 2147483647, %v1193_v51 }
  0xbe   :  { %v181_v53 = vpop.permute.xlu0 %180  ;;  %886 = vlog2.f32 %v324_v60  ;;  %v1230_v30 = vsub.f32 %v209_v52, %v1166_v4  ;;  %v328_v42 = vadd.f32 1.0, %v327_v25  ;;  %v287_v54 = vmul.f32 1.442695, %v261_v35 }
  0xbf   :  { %v1196_v56 = vsub.f32 %v181_v53, %v1166_v4  ;;  %v256_v59 = vsub.f32 0.0, %v240_v50  ;;  %888 = vpow2.f32 %v273_v63  ;;  %v263_v55 = vsub.f32 0.0, %v247_v36 }
  0xc0   :  { %v249_v44 = vand.u32 2147483647, %v1230_v30  ;;  %v329_v63 = vmul.f32 %v1193_v51, %v328_v42  ;;  %vm1258_vm0 = vcmp.lt.f32.partialorder %v330_v47, 0.0004427343  ;;  %v301_v51 = vmax.f32 %v1178_v17, 0.0 }
  0xc1   :  { %v242_v0 = vand.u32 2147483647, %v1196_v56  ;;  %v277_v2 = vmul.f32 1.442695, %v256_v59  ;;  %v1218_v13 = vpop.eup %880  ;;  %v299_v59 = vmax.f32 %v1174_v33, 0.0 }
  0xc2   :  { %v1205_v62 = vpop.permute.xlu1 %57  ;;  %v189_v3 = vpop.permute.xlu0 %188  ;;  %v315_v24 = vadd.f32 1.0, %v1218_v13  ;;  %v265_v1 = vsub.f32 0.0, %v249_v44  ;;  %v291_v19 = vmul.f32 1.442695, %v263_v55  ;;  %v321_v42 = vand.u32 2147483647, %v1218_v13 }
  0xc3   :  { %v1211_v7 = vsub.f32 %v189_v3, %v1166_v4  ;;  %v258_v9 = vsub.f32 0.0, %v242_v0  ;;  %890 = vpow2.f32 %v277_v2  ;;  %v318_v2 = vmul.f32 -0.5, %v1218_v13 }
  0xc4   :  { %vm1295_vm1 = vcmp.lt.f32.partialorder %v321_v42, 0.0004427343 }
  0xc5   :  { %v244_v20 = vand.u32 2147483647, %v1211_v7  ;;  %v281_v23 = vmul.f32 1.442695, %v258_v9  ;;  %v1227_v15 = vpop.eup %882 }
  0xc6   :  { %v1216_v10 = vpop.permute.xlu1 %67  ;;  %v197_v12 = vpop.permute.xlu0 %196  ;;  %v333_v40 = vadd.f32 1.0, %v1227_v15 }
  0xc7   :  { %v1232_v31 = vpop.eup %884  ;;  %v260_v32 = vsub.f32 0.0, %v244_v20  ;;  %892 = vpow2.f32 %v281_v23  ;;  %v1238_v37 = vsub.f32 %v197_v12, %v1166_v4 }
  0xc8   :  { %v887_v34 = vpop.eup %886  ;;  %894 = vlog2.f32 %v315_v24  ;;  %v351_v48 = vadd.f32 1.0, %v1232_v31  ;;  %v336_v24 = vmul.f32 -0.5, %v1227_v15  ;;  %v354_v44 = vmul.f32 -0.5, %v1232_v31 }
  0xc9   :  { %v1242_v43 = vpop.eup %888  ;;  %896 = vpow2.f32 %v279_v29  ;;  %v285_v52 = vmul.f32 1.442695, %v260_v32  ;;  %v326_v28 = vmul.f32 0.6931472, %v887_v34  ;;  %v246_v57 = vand.u32 2147483647, %v1238_v37 }
  0xca   :  { %v1234_v16 = vpop.permute.xlu1 %72  ;;  %v205_v46 = vpop.permute.xlu0 %204  ;;  %898 = vpow2.f32 %v283_v5  ;;  %v342_v0 = vadd.f32 1.0, %v1242_v43  ;;  %v295_v5 = vmul.f32 1.442695, %v265_v1  ;;  %v319_v32 = vadd.f32 1.0, %v318_v2 }
  0xcb   :  { %900 = vlog2.f32 %v333_v40  ;;  %v332_v9 = vsel %vm1258_vm0, %v329_v63, %v326_v28  ;;  %v262_v20 = vsub.f32 0.0, %v246_v57  ;;  %v1269_v12 = vsub.f32 %v205_v46, %v1166_v4 }
  0xcc   :  { %902 = vlog2.f32 %v351_v48  ;;  %v460_v34 = vadd.f32 %v332_v9, %v300_v39  ;;  %v337_v28 = vadd.f32 1.0, %v336_v24  ;;  %v320_v63 = vmul.f32 %v1218_v13, %v319_v32 }
  0xcd   :  { %v1249_v53 = vpop.eup %890  ;;  %904 = vpow2.f32 %v285_v52  ;;  %v289_v48 = vmul.f32 1.442695, %v262_v20  ;;  %v339_v52 = vand.u32 2147483647, %v1227_v15  ;;  %v248_v39 = vand.u32 2147483647, %v1269_v12 }
  0xce   :  { %v1253_v60 = vpop.permute.xlu1 %82  ;;  %v360_v18 = vadd.f32 1.0, %v1249_v53  ;;  %906 = vpow2.f32 %v287_v54  ;;  %v213_v21 = vpop.permute.xlu0 %212  ;;  %v355_v9 = vadd.f32 1.0, %v354_v44  ;;  %v357_v13 = vand.u32 2147483647, %v1232_v31 }
  0xcf   :  { %908 = vlog2.f32 %v342_v0  ;;  %v1276_v36 = vsub.f32 %v213_v21, %v1166_v4  ;;  %v345_v4 = vmul.f32 -0.5, %v1242_v43  ;;  %v1292_v0 = vmul.f32 0.5, %v460_v34 }
  0xd0   :  { %910 = vlog2.f32 %v360_v18  ;;  %vm1300_vm2 = vcmp.lt.f32.partialorder %v339_v52, 0.0004427343  ;;  %v363_v21 = vmul.f32 -0.5, %v1249_v53  ;;  %v338_v34 = vmul.f32 %v1227_v15, %v337_v28  ;;  %v1321_v15 = vld [vmem:[%s1570_s1 + $0x1] ss:$0 sm:$0xff]  ;;  %s970_s1 = smov [#allocation3]  }
  0xd1   :  { %v1272_v25 = vpop.eup %892  ;;  %912 = vpow2.f32 %v291_v19  ;;  %v250_v2 = vand.u32 2147483647, %v1276_v36  ;;  %v348_v52 = vand.u32 2147483647, %v1242_v43  ;;  %v356_v28 = vmul.f32 %v1232_v31, %v355_v9  ;;  %s851_s17 = sshll.u32 %s970_s1, 4  ;;  %s852_s17 = int_to_ptr.vmem [resolvable:$true] %s851_s17 }
  0xd2   :  { %v895_v35 = vpop.eup %894  ;;  %v1278_v40 = vpop.permute.xlu1 %87  ;;  %v378_v54 = vadd.f32 1.0, %v1272_v25  ;;  %914 = vpow2.f32 %v295_v5  ;;  %v264_v5 = vsub.f32 0.0, %v248_v39  ;;  %v381_v39 = vmul.f32 -0.5, %v1272_v25  ;;  %s942_s19 = scalar_lea.vmem %s852_s17, 16  ;;  %s946_s20 = scalar_lea.vmem %s852_s17, 32 }
  0xd3   :  { %v1282_v46 = vpop.eup %896  ;;  %v317_v57 = vmul.f32 0.6931472, %v895_v35  ;;  %916 = vpow2.f32 %v289_v48  ;;  %v346_v35 = vadd.f32 1.0, %v345_v4  ;;  %v266_v47 = vsub.f32 0.0, %v250_v2  ;;  %p943_p0 = scmp.ne.s32.totalorder %s852_s17, %s942_s19  ;;  %p947_p1 = scmp.lt.s32.totalorder %s852_s17, %s852_s17 }
  0xd4   :  { %v1289_v55 = vpop.eup %898  ;;  %v369_v18 = vadd.f32 1.0, %v1282_v46  ;;  %918 = vlog2.f32 %v378_v54  ;;  %vm1324_vm3 = vcmp.lt.f32.partialorder %v357_v13, 0.0004427343  ;;  %v364_v54 = vadd.f32 1.0, %v363_v21  ;;  %p948_p2 = scmp.lt.s32.totalorder %s946_s20, %s942_s19 }
  0xd5   :  { %v901_v1 = vpop.eup %900  ;;  %v323_v44 = vsel %vm1295_vm1, %v320_v63, %v317_v57  ;;  %v387_v6 = vadd.f32 1.0, %v1289_v55  ;;  %vm135_vm4 = vcmp.gt.f32.partialorder %v1321_v15, %v1205_v62  ;;  %v347_v3 = vmul.f32 %v1242_v43, %v346_v35 }
  0xd6   :  { %v903_v19 = vpop.eup %902  ;;  %v1308_v32 = vpop.permute.xlu1 %97  ;;  %v335_v48 = vmul.f32 0.6931472, %v901_v1  ;;  %920 = vlog2.f32 %v369_v18  ;;  %v293_v1 = vmul.f32 1.442695, %v264_v5  ;;  %v459_v2 = vadd.f32 %v323_v44, %v299_v59  ;;  %p949_p3 = por %p948_p2, %p947_p1 }
  0xd7   :  { %v1306_v24 = vpop.eup %904  ;;  %v353_v29 = vmul.f32 0.6931472, %v903_v19  ;;  %v366_v18 = vand.u32 2147483647, %v1249_v53  ;;  %922 = vlog2.f32 %v387_v6  ;;  %v297_v21 = vmul.f32 1.442695, %v266_v47 }
  0xd8   :  { %v1311_v42 = vpop.eup %906  ;;  %v396_v57 = vadd.f32 1.0, %v1306_v24  ;;  %v341_v9 = vsel %vm1300_vm2, %v338_v34, %v335_v48  ;;  %vm1344_vm5 = vcmp.lt.f32.partialorder %v348_v52, 0.0004427343  ;;  %v382_v43 = vadd.f32 1.0, %v381_v39  ;;  %p950_p4 = pnand %p949_p3, %p943_p0 }
  0xd9   :  { %v909_v50 = vpop.eup %908  ;;  %v405_v13 = vadd.f32 1.0, %v1311_v42  ;;  %v359_v33 = vsel %vm1324_vm3, %v356_v28, %v353_v29  ;;  %v365_v20 = vmul.f32 %v1249_v53, %v364_v54  ;;  %vm136_vm6 = vcmp.gt.f32.partialorder %v1321_v15, %v1149_v11 }
  0xda   :  { %v911_v63 = vpop.eup %910  ;;  %v344_v19 = vmul.f32 0.6931472, %v909_v50  ;;  %v1340_v23 = vpop.permute.xlu1 %102  ;;  %v372_v50 = vmul.f32 -0.5, %v1282_v46  ;;  %924 = vlog2.f32 %v396_v57  ;;  %v461_v6 = vadd.f32 %v341_v9, %v301_v51 }
  0xdb   :  { %v1335_v31 = vpop.eup %912  ;;  %v362_v35 = vmul.f32 0.6931472, %v911_v63  ;;  %926 = vpow2.f32 %v293_v1  ;;  %vm1356_vm7 = vcmp.lt.f32.partialorder %v366_v18, 0.0004427343  ;;  %v384_v47 = vand.u32 2147483647, %v1272_v25 }
  0xdc   :  { %v1348_v5 = vpop.eup %914  ;;  %v571_v44 = vmul.f32 0.5, %v459_v2  ;;  %v463_v53 = vadd.f32 %v359_v33, %v303_v49  ;;  %v350_v48 = vsel %vm1344_vm5, %v347_v3, %v344_v19  ;;  %928 = vlog2.f32 %v405_v13 }
  0xdd   :  { %v1361_v34 = vpop.eup %916  ;;  %930 = vpow2.f32 %v297_v21  ;;  %v383_v51 = vmul.f32 %v1272_v25, %v382_v43  ;;  %v375_v39 = vand.u32 2147483647, %v1282_v46  ;;  %v390_v28 = vmul.f32 -0.5, %v1289_v55 }
  0xde   :  { %v919_v52 = vpop.eup %918  ;;  %v368_v54 = vsel %vm1356_vm7, %v365_v20, %v362_v35  ;;  %v373_v57 = vadd.f32 1.0, %v372_v50  ;;  %v399_v38 = vmul.f32 -0.5, %v1306_v24  ;;  %vm137_vm8 = vcmp.gt.f32.partialorder %v1321_v15, %v1216_v10 }
  0xdf   :  { %vm138_vm9 = vcmp.gt.f32.partialorder %v1321_v15, %v1234_v16  ;;  %v573_v63 = vmul.f32 0.5, %v461_v6  ;;  %v1584_v25 = vmax.f32 %v1185_v41, 0.0  ;;  %vm1379_vm10 = vcmp.lt.f32.partialorder %v384_v47, 0.0004427343 }
  0xe0   :  { %v921_v49 = vpop.eup %920  ;;  %v393_v3 = vand.u32 2147483647, %v1289_v55  ;;  %v575_v9 = vmul.f32 0.5, %v463_v53  ;;  %v380_v19 = vmul.f32 0.6931472, %v919_v52  ;;  %v414_v13 = vadd.f32 1.0, %v1361_v34 }
  0xe1   :  { %v462_v1 = vadd.f32 %v350_v48, %v1584_v25  ;;  %v1587_v41 = vmax.f32 %v1189_v45, 0.0  ;;  %vm1390_vm11 = vcmp.lt.f32.partialorder %v375_v39, 0.0004427343  ;;  %v391_v35 = vadd.f32 1.0, %v390_v28  ;;  %v923_v50 = vpop.eup %922 }
  0xe2   :  { %v402_v20 = vand.u32 2147483647, %v1306_v24  ;;  %v371_v6 = vmul.f32 0.6931472, %v921_v49  ;;  %v374_v29 = vmul.f32 %v1282_v46, %v373_v57  ;;  %v400_v47 = vadd.f32 1.0, %v399_v38 }
  0xe3   :  { %v464_v59 = vadd.f32 %v368_v54, %v1587_v41  ;;  %vm139_vm12 = vcmp.gt.f32.partialorder %v1321_v15, %v1153_v22  ;;  %vm1399_vm13 = vcmp.lt.f32.partialorder %v393_v3, 0.0004427343  ;;  %v408_v53 = vmul.f32 -0.5, %v1311_v42 }
  0xe4   :  { %v423_v48 = vadd.f32 1.0, %v1335_v31  ;;  %v925_v52 = vpop.eup %924  ;;  %v386_v46 = vsel %vm1379_vm10, %v383_v51, %v380_v19  ;;  %932 = vlog2.f32 %v414_v13  ;;  %v389_v57 = vmul.f32 0.6931472, %v923_v50 }
  0xe5   :  { %v1410_v39 = vpop.eup %926  ;;  %v576_v54 = vmul.f32 0.5, %v464_v59  ;;  %v392_v38 = vmul.f32 %v1289_v55, %v391_v35  ;;  %vm1413_vm14 = vcmp.lt.f32.partialorder %v402_v20, 0.0004427343  ;;  %v377_v25 = vsel %vm1390_vm11, %v374_v29, %v371_v6 }
  0xe6   :  { %v401_v51 = vmul.f32 %v1306_v24, %v400_v47  ;;  %v1594_v3 = vmax.f32 %v1196_v56, 0.0  ;;  %v398_v19 = vmul.f32 0.6931472, %v925_v52  ;;  %v409_v55 = vadd.f32 1.0, %v408_v53 }
  0xe7   :  { %934 = vlog2.f32 %v423_v48  ;;  %v417_v24 = vmul.f32 -0.5, %v1361_v34  ;;  %v1595_v56 = vmax.f32 %v1199_v58, 0.0  ;;  %v395_v43 = vsel %vm1399_vm13, %v392_v38, %v389_v57 }
  0xe8   :  { %v432_v35 = vadd.f32 1.0, %v1410_v39  ;;  %v309_v10 = vmax.f32 %v1214_v8, 0.0  ;;  %v308_v20 = vmax.f32 %v1211_v7, 0.0  ;;  %vm140_vm15 = vcmp.gt.f32.partialorder %v1321_v15, %v1253_v60 }
  0xe9   :  { %v465_v59 = vadd.f32 %v377_v25, %v1595_v56  ;;  %v404_v58 = vsel %vm1413_vm14, %v401_v51, %v398_v19  ;;  %v410_v6 = vmul.f32 %v1311_v42, %v409_v55  ;;  %v1598_v60 = vmax.f32 %v1203_v61, 0.0 }
  0xea   :  { %v418_v48 = vadd.f32 1.0, %v417_v24  ;;  %936 = vlog2.f32 %v432_v35  ;;  %vm16_vm1 = vcmask 7168   ;;  %vm142_vm2 = vcmp.gt.f32.partialorder %v1321_v15, %v1157_v26 }
  0xeb   :  { %v467_v47 = vadd.f32 %v395_v43, %v1598_v60  ;;  %v577_v53 = vmul.f32 0.5, %v465_v59  ;;  %v426_v61 = vmul.f32 -0.5, %v1335_v31  ;;  %vm141_vm3 = vcmp.gt.f32.partialorder %v1321_v15, %v1278_v40 }
  0xec   :  { %v441_v25 = vadd.f32 1.0, %v1348_v5  ;;  %v310_v26 = vmax.f32 %v1238_v37, 0.0  ;;  %v435_v40 = vmul.f32 -0.5, %v1410_v39  ;;  %vm143_vm5 = vcmp.gt.f32.partialorder %v1321_v15, %v1308_v32 }
  0xed   :  { %v427_v55 = vadd.f32 1.0, %v426_v61  ;;  %v444_v60 = vmul.f32 -0.5, %v1348_v5 }
  0xee   :  { %938 = vlog2.f32 %v441_v25  ;;  %v436_v35 = vadd.f32 1.0, %v435_v40 }
  0xef   :  { %v428_v32 = vmul.f32 %v1335_v31, %v427_v55 }
  0xf0   :  { %v437_v29 = vmul.f32 %v1410_v39, %v436_v35 }
  0xfa   :  { %v590_v17 = vpop.permute.xlu1 %589 }
  0xfb   :  { %v667_v4 = vadd.f32 %v590_v17, %v571_v44  ;;  %v574_v44 = vmul.f32 0.5, %v462_v1  ;;  %v411_v1 = vand.u32 2147483647, %v1311_v42 }
  0xfd   :  { %v683_v18 = vsel %vm135_vm4, %v667_v4, 0.0  ;;  %vm1446_vm0 = vcmp.lt.f32.partialorder %v411_v1, 0.0004427343 }
  0xfe   :  { %v600_v21 = vpop.permute.xlu1 %599  ;;  %715 = vadd.xlane.f32.xlu1 %v683_v18  ;;  %v595_v33 = vpop.permute.xlu0 %594  ;;  %v466_v18 = vadd.f32 %v386_v46, %v1594_v3  ;;  %v969_v46 = vmov 0.0  }
  0xff   :  { %v668_v62 = vadd.f32 %v595_v33, %v1292_v0  ;;  %v669_v17 = vadd.f32 %v600_v21, %v573_v63  ;;  %v929_v63 = vpop.eup %928  ;;  %17 = vst.msk [vmem:[#allocation2] sm:$0xff] %vm16_vm1, %v969_v46  ;;  %18 = vst.msk [vmem:[#allocation2 + $0x8] sm:$0xff] %vm16_vm1, %v969_v46 }
 0x100   :  { %v1421_v2 = vpop.eup %930  ;;  %19 = vst.msk [vmem:[#allocation2 + $0x10] sm:$0xff] %vm16_vm1, %v969_v46  ;;  %20 = vst.msk [vmem:[#allocation2 + $0x18] sm:$0xff] %vm16_vm1, %v969_v46 }
 0x101   :  { %v684_v0 = vsel %vm136_vm6, %v668_v62, 0.0  ;;  %v685_v21 = vsel %vm137_vm8, %v669_v17, 0.0  ;;  %v578_v62 = vmul.f32 0.5, %v466_v18  ;;  %v933_v52 = vpop.eup %932  ;;  %21 = vst.msk [vmem:[#allocation2 + $0x20] sm:$0xff] %vm16_vm1, %v969_v46  ;;  %22 = vst.msk [vmem:[#allocation2 + $0x28] sm:$0xff] %vm16_vm1, %v969_v46  ;;  %vm144_vm6 = vcmp.gt.f32.partialorder %v1321_v15, %v1340_v23 }
 0x102   :  { %v610_v28 = vpop.permute.xlu1 %609  ;;  %717 = vadd.xlane.f32.xlu0 %v684_v0  ;;  %v605_v4 = vpop.permute.xlu0 %604  ;;  %v468_v0 = vadd.f32 %v404_v58, %v308_v20  ;;  %23 = vst.msk [vmem:[#allocation2 + $0x30] sm:$0xff] %vm16_vm1, %v969_v46  ;;  %24 = vst.msk [vmem:[#allocation2 + $0x38] sm:$0xff] %vm16_vm1, %v969_v46  ;;  %v450_v43 = vadd.f32 1.0, %v1421_v2  ;;  %v438_v23 = vand.u32 2147483647, %v1410_v39  ;;  %vm145_vm8 = vcmp.gt.f32.partialorder %v1321_v15, %v1161_v27 }
 0x103   :  { %v670_v11 = vadd.f32 %v605_v4, %v574_v44  ;;  %v671_v13 = vadd.f32 %v610_v28, %v575_v9  ;;  %v407_v9 = vmul.f32 0.6931472, %v929_v63  ;;  %v420_v44 = vand.u32 2147483647, %v1361_v34  ;;  %25 = vst.msk [vmem:[#allocation2 + $0x40] sm:$0xff] %vm16_vm1, %v969_v46  ;;  %26 = vst.msk [vmem:[#allocation2 + $0x48] sm:$0xff] %vm16_vm1, %v969_v46  ;;  %v935_v38 = vpop.eup %934 }
 0x104   :  { %27 = vst.msk [vmem:[#allocation2 + $0x50] sm:$0xff] %vm16_vm1, %v969_v46  ;;  %28 = vst.msk [vmem:[#allocation2 + $0x58] sm:$0xff] %vm16_vm1, %v969_v46  ;;  %v579_v4 = vmul.f32 0.5, %v467_v47  ;;  %v416_v63 = vmul.f32 0.6931472, %v933_v52  ;;  %v580_v3 = vmul.f32 0.5, %v468_v0  ;;  %940 = vlog2.f32 %v450_v43 }
 0x105   :  { %v686_v33 = vsel %vm138_vm9, %v670_v11, 0.0  ;;  %v687_v7 = vsel %vm139_vm12, %v671_v13, 0.0  ;;  %v413_v42 = vsel %vm1446_vm0, %v410_v6, %v407_v9  ;;  %29 = vst.msk [vmem:[#allocation2 + $0x60] sm:$0xff] %vm16_vm1, %v969_v46  ;;  %30 = vst.msk [vmem:[#allocation2 + $0x68] sm:$0xff] %vm16_vm1, %v969_v46  ;;  %v419_v11 = vmul.f32 %v1361_v34, %v418_v48  ;;  %v937_v9 = vpop.eup %936 }
 0x106   :  { %v615_v41 = vpop.permute.xlu1 %614  ;;  %719 = vadd.xlane.f32.xlu0 %v685_v21  ;;  %721 = vadd.xlane.f32.xlu1 %v686_v33  ;;  %31 = vst.msk [vmem:[#allocation2 + $0x70] sm:$0xff] %vm16_vm1, %v969_v46  ;;  %32 = vst.msk [vmem:[#allocation2 + $0x78] sm:$0xff] %vm16_vm1, %v969_v46  ;;  %v469_v57 = vadd.f32 %v413_v42, %v309_v10  ;;  %vm1484_vm4 = vcmp.lt.f32.partialorder %v420_v44, 0.0004427343  ;;  %v429_v21 = vand.u32 2147483647, %v1335_v31 }
 0x107   :  { %v672_v16 = vadd.f32 %v615_v41, %v576_v54  ;;  %v1441_v50 = vpop.permute.xlu0 %122  ;;  %v425_v24 = vmul.f32 0.6931472, %v935_v38  ;;  %v422_v37 = vsel %vm1484_vm4, %v419_v11, %v416_v63  ;;  %v434_v6 = vmul.f32 0.6931472, %v937_v9  ;;  %v702_v9 = vld [vmem:[#allocation2 + $0x18] sm:$0xff] }
 0x108   :  { %v581_v13 = vmul.f32 0.5, %v469_v57  ;;  %vm430_vm7 = vcmp.lt.f32.partialorder %v429_v21, 0.0004427343  ;;  %v470_v10 = vadd.f32 %v422_v37, %v310_v26  ;;  %vm1504_vm9 = vcmp.lt.f32.partialorder %v438_v23, 0.0004427343  ;;  %v699_v37 = vld [vmem:[#allocation2] sm:$0xff] }
 0x109   :  { %v688_v8 = vsel %vm140_vm15, %v672_v16, 0.0  ;;  %v431_v20 = vsel %vm430_vm7, %v428_v32, %v425_v24  ;;  %v312_v27 = vmax.f32 %v1269_v12, 0.0  ;;  %v453_v39 = vmul.f32 -0.5, %v1421_v2  ;;  %v701_v32 = vld [vmem:[#allocation2 + $0x10] sm:$0xff] }
 0x10a   :  { %v625_v45 = vpop.permute.xlu1 %624  ;;  %723 = vadd.xlane.f32.xlu0 %v687_v7  ;;  %725 = vadd.xlane.f32.xlu1 %v688_v8  ;;  %v582_v31 = vmul.f32 0.5, %v470_v10  ;;  %v445_v52 = vadd.f32 1.0, %v444_v60  ;;  %v447_v12 = vand.u32 2147483647, %v1348_v5  ;;  %vm148_vm14 = vcmp.gt.f32.partialorder %v1321_v15, %v1441_v50  ;;  %v705_v8 = vld [vmem:[#allocation2 + $0x30] sm:$0xff] }
 0x10b   :  { %v674_v17 = vadd.f32 %v625_v45, %v578_v62  ;;  %v311_v62 = vmax.f32 %v1223_v14, 0.0  ;;  %v939_v45 = vpop.eup %938  ;;  %v454_v46 = vadd.f32 1.0, %v453_v39 }
 0x10c   :  { %v620_v22 = vpop.permute.xlu0 %619  ;;  %v443_v61 = vmul.f32 0.6931472, %v939_v45  ;;  %v446_v57 = vmul.f32 %v1348_v5, %v445_v52  ;;  %vm448_vm12 = vcmp.lt.f32.partialorder %v447_v12, 0.0004427343  ;;  %v314_v5 = vmax.f32 %v1276_v36, 0.0  ;;  %v700_v36 = vld [vmem:[#allocation2 + $0x8] sm:$0xff] }
 0x10d   :  { %v673_v28 = vadd.f32 %v620_v22, %v577_v53  ;;  %v690_v54 = vsel %vm142_vm2, %v674_v17, 0.0  ;;  %v471_v7 = vadd.f32 %v431_v20, %v311_v62  ;;  %v440_v53 = vsel %vm1504_vm9, %v437_v29, %v434_v6  ;;  %v708_v45 = vld [vmem:[#allocation2 + $0x48] sm:$0xff] }
 0x10e   :  { %v630_v49 = vpop.permute.xlu1 %629  ;;  %729 = vadd.xlane.f32.xlu1 %v690_v54  ;;  %v472_v22 = vadd.f32 %v440_v53, %v312_v27  ;;  %v456_v54 = vand.u32 2147483647, %v1421_v2  ;;  %v449_v63 = vsel %vm448_vm12, %v446_v57, %v443_v61  ;;  %v455_v25 = vmul.f32 %v1421_v2, %v454_v46  ;;  %v709_v61 = vld [vmem:[#allocation2 + $0x50] sm:$0xff] }
 0x10f   :  { %v675_v51 = vadd.f32 %v630_v49, %v579_v4  ;;  %v689_v1 = vsel %vm141_vm3, %v673_v28, 0.0  ;;  %v583_v42 = vmul.f32 0.5, %v471_v7  ;;  %v941_v28 = vpop.eup %940  ;;  %v706_v7 = vld [vmem:[#allocation2 + $0x38] sm:$0xff] }
 0x110   :  { %727 = vadd.xlane.f32.xlu0 %v689_v1  ;;  %v635_v19 = vpop.permute.xlu0 %634  ;;  %v584_v38 = vmul.f32 0.5, %v472_v22  ;;  %v452_v11 = vmul.f32 0.6931472, %v941_v28  ;;  %vm457_vm13 = vcmp.lt.f32.partialorder %v456_v54, 0.0004427343 }
 0x111   :  { %v676_v34 = vadd.f32 %v635_v19, %v580_v3  ;;  %v691_v56 = vsel %vm143_vm5, %v675_v51, 0.0  ;;  %v313_v51 = vmax.f32 %v1230_v30, 0.0 }
 0x112   :  { %v640_v33 = vpop.permute.xlu1 %639  ;;  %v458_v19 = vsel %vm457_vm13, %v455_v25, %v452_v11 }
 0x113   :  { %v677_v41 = vadd.f32 %v640_v33, %v581_v13  ;;  %v692_v59 = vsel %vm144_vm6, %v676_v34, 0.0  ;;  %v473_v3 = vadd.f32 %v449_v63, %v313_v51  ;;  %v474_v40 = vadd.f32 %v458_v19, %v314_v5  ;;  %v710_v63 = vld [vmem:[#allocation2 + $0x58] sm:$0xff] }
 0x114   :  { %731 = vadd.xlane.f32.xlu0 %v691_v56  ;;  %733 = vadd.xlane.f32.xlu1 %v692_v59  ;;  %v650_v14 = vpop.permute.xlu0 %649 }
 0x115   :  { %v693_v58 = vsel %vm145_vm8, %v677_v41, 0.0  ;;  %v679_v17 = vadd.f32 %v650_v14, %v583_v42  ;;  %v585_v55 = vmul.f32 0.5, %v473_v3  ;;  %v586_v30 = vmul.f32 0.5, %v474_v40  ;;  %v707_v14 = vld [vmem:[#allocation2 + $0x40] sm:$0xff] }
 0x116   :  { %v645_v16 = vpop.permute.xlu1 %644  ;;  %v711_v3 = vld [vmem:[#allocation2 + $0x60] sm:$0xff] }
 0x117   :  { %v678_v47 = vadd.f32 %v645_v16, %v582_v31  ;;  %v704_v16 = vld [vmem:[#allocation2 + $0x28] sm:$0xff] }
 0x118   :  { %735 = vadd.xlane.f32.xlu0 %v693_v58 }
 0x11b   :  { %v113_v44 = vpop.permute.xlu1 %112 }
 0x11c   :  { %vm146_vm10 = vcmp.gt.f32.partialorder %v1321_v15, %v113_v44 }
 0x11d   :  { %v694_v48 = vsel %vm146_vm10, %v678_v47, 0.0 }
 0x11e   :  { %737 = vadd.xlane.f32.xlu1 %v694_v48 }
 0x11f   :  { %v118_v0 = vpop.permute.xlu1 %117 }
 0x120   :  { %vm147_vm11 = vcmp.gt.f32.partialorder %v1321_v15, %v118_v0 }
 0x121   :  { %v695_v4 = vsel %vm147_vm11, %v679_v17, 0.0 }
 0x122   :  { %739 = vadd.xlane.f32.xlu0 %v695_v4 }
 0x124   :  { %v655_v49 = vpop.permute.xlu1 %654 }
 0x125   :  { %v680_v1 = vadd.f32 %v655_v49, %v584_v38 }
 0x127   :  { %v696_v18 = vsel %vm148_vm14, %v680_v1, 0.0 }
 0x128   :  { %v660_v26 = vpop.permute.xlu1 %659  ;;  %741 = vadd.xlane.f32.xlu1 %v696_v18 }
 0x129   :  { %v681_v34 = vadd.f32 %v660_v26, %v585_v55 }
 0x12b   :  { %v665_v21 = vpop.permute.xlu0 %664 }
 0x12c   :  { %v682_v33 = vadd.f32 %v665_v21, %v586_v30  ;;  %v712_v21 = vld [vmem:[#allocation2 + $0x68] sm:$0xff] }
 0x12d   :  { %v128_v13 = vpop.permute.xlu1 %127 }
 0x12e   :  { %vm149_vm15 = vcmp.gt.f32.partialorder %v1321_v15, %v128_v13 }
 0x12f   :  { %v697_v2 = vsel %vm149_vm15, %v681_v34, 0.0 }
 0x130   :  { %743 = vadd.xlane.f32.xlu0 %v697_v2 }
 0x131   :  { %v133_v24 = vpop.permute.xlu1 %132 }
 0x132   :  { %vm150_vm0 = vcmp.gt.f32.partialorder %v1321_v15, %v133_v24  ;;  %v703_v15 = vld [vmem:[#allocation2 + $0x20] sm:$0xff] }
 0x133   :  { %v698_v50 = vsel %vm150_vm0, %v682_v33, 0.0 }
 0x134   :  { %745 = vadd.xlane.f32.xlu1 %v698_v50 }
 0x18b   :  { %v716_v41 = vpop.xlane.xlu1 %715 }
 0x18c   :  { %v747_v56 = vadd.f32 %v716_v41, %v699_v37 }
 0x18e   :  { %764 = vst.msk [vmem:[#allocation2] sm:$0xff] %vm16_vm1, %v747_v56 }
 0x18f   :  { %v718_v59 = vpop.xlane.xlu0 %717 }
 0x190   :  { %v748_v43 = vadd.f32 %v718_v59, %v700_v36  ;;  %v713_v36 = vld [vmem:[#allocation2 + $0x70] sm:$0xff] }
 0x192   :  { %765 = vst.msk [vmem:[#allocation2 + $0x8] sm:$0xff] %vm16_vm1, %v748_v43 }
 0x193   :  { %v722_v35 = vpop.xlane.xlu1 %721  ;;  %v720_v10 = vpop.xlane.xlu0 %719 }
 0x194   :  { %v750_v23 = vadd.f32 %v722_v35, %v702_v9  ;;  %v749_v20 = vadd.f32 %v720_v10, %v701_v32 }
 0x195   :  { %v783_v53 = vld [vmem:[#allocation2] sm:$0xff] }
 0x196   :  { %767 = vst.msk [vmem:[#allocation2 + $0x18] sm:$0xff] %vm16_vm1, %v750_v23  ;;  %766 = vst.msk [vmem:[#allocation2 + $0x10] sm:$0xff] %vm16_vm1, %v749_v20  ;;  %v799_v22 = vsel %vm16_vm1, %v783_v53, 0.0  ;;  %v714_v23 = vld [vmem:[#allocation2 + $0x78] sm:$0xff] }
 0x197   :  { %v726_v62 = vpop.xlane.xlu1 %725  ;;  %v724_v58 = vpop.xlane.xlu0 %723 }
 0x198   :  { %v752_v6 = vadd.f32 %v726_v62, %v704_v16  ;;  %v751_v29 = vadd.f32 %v724_v58, %v703_v15 }
 0x199   :  { %v784_v47 = vld [vmem:[#allocation2 + $0x8] sm:$0xff] }
 0x19a   :  { %769 = vst.msk [vmem:[#allocation2 + $0x28] sm:$0xff] %vm16_vm1, %v752_v6  ;;  %768 = vst.msk [vmem:[#allocation2 + $0x20] sm:$0xff] %vm16_vm1, %v751_v29  ;;  %v800_v42 = vsel %vm16_vm1, %v784_v47, 0.0 }
 0x19b   :  { %v730_v31 = vpop.xlane.xlu1 %729  ;;  %v801_v46 = vadd.f32 %v800_v42, %v799_v22 }
 0x19c   :  { %v754_v60 = vadd.f32 %v730_v31, %v706_v7 }
 0x19d   :  { %v728_v27 = vpop.xlane.xlu0 %727  ;;  %v785_v39 = vld [vmem:[#allocation2 + $0x10] sm:$0xff]  ;;  %v786_v4 = vld [vmem:[#allocation2 + $0x18] sm:$0xff] }
 0x19e   :  { %771 = vst.msk [vmem:[#allocation2 + $0x38] sm:$0xff] %vm16_vm1, %v754_v60  ;;  %v753_v44 = vadd.f32 %v728_v27, %v705_v8  ;;  %v802_v12 = vsel %vm16_vm1, %v785_v39, 0.0  ;;  %v804_v49 = vsel %vm16_vm1, %v786_v4, 0.0 }
 0x19f   :  { %v803_v54 = vadd.f32 %v802_v12, %v801_v46 }
 0x1a0   :  { %770 = vst.msk [vmem:[#allocation2 + $0x30] sm:$0xff] %vm16_vm1, %v753_v44 }
 0x1a1   :  { %v734_v48 = vpop.xlane.xlu1 %733  ;;  %v732_v52 = vpop.xlane.xlu0 %731  ;;  %v787_v38 = vld [vmem:[#allocation2 + $0x20] sm:$0xff]  ;;  %v805_v11 = vadd.f32 %v804_v49, %v803_v54  ;;  %v788_v18 = vld [vmem:[#allocation2 + $0x28] sm:$0xff] }
 0x1a2   :  { %v756_v17 = vadd.f32 %v734_v48, %v708_v45  ;;  %v755_v0 = vadd.f32 %v732_v52, %v707_v14  ;;  %v806_v25 = vsel %vm16_vm1, %v787_v38, 0.0  ;;  %v808_v40 = vsel %vm16_vm1, %v788_v18, 0.0 }
 0x1a3   :  { %v807_v19 = vadd.f32 %v806_v25, %v805_v11 }
 0x1a4   :  { %773 = vst.msk [vmem:[#allocation2 + $0x48] sm:$0xff] %vm16_vm1, %v756_v17  ;;  %772 = vst.msk [vmem:[#allocation2 + $0x40] sm:$0xff] %vm16_vm1, %v755_v0 }
 0x1a5   :  { %v736_v28 = vpop.xlane.xlu0 %735  ;;  %v809_v13 = vadd.f32 %v808_v40, %v807_v19  ;;  %v790_v30 = vld [vmem:[#allocation2 + $0x38] sm:$0xff] }
 0x1a6   :  { %v757_v57 = vadd.f32 %v736_v28, %v709_v61  ;;  %v812_v37 = vsel %vm16_vm1, %v790_v30, 0.0  ;;  %v839_v28 = vlaneseq }
 0x1a7   :  { %v789_v26 = vld [vmem:[#allocation2 + $0x30] sm:$0xff] }
 0x1a8   :  { %774 = vst.msk [vmem:[#allocation2 + $0x50] sm:$0xff] %vm16_vm1, %v757_v57  ;;  %v810_v34 = vsel %vm16_vm1, %v789_v26, 0.0  ;;  %v840_v4 = vand.u32 127, %v839_v28 }
 0x1a9   :  { %v811_v2 = vadd.f32 %v810_v34, %v809_v13 }
 0x1aa   :  { %vm841_vm2 = vcmp.eq.s32.totalorder %v840_v4, 0 }
 0x1ab   :  { %v738_v51 = vpop.xlane.xlu1 %737  ;;  %v791_v24 = vld [vmem:[#allocation2 + $0x40] sm:$0xff]  ;;  %v813_v41 = vadd.f32 %v812_v37, %v811_v2  ;;  %v792_v59 = vld [vmem:[#allocation2 + $0x48] sm:$0xff] }
 0x1ac   :  { %v758_v1 = vadd.f32 %v738_v51, %v710_v63  ;;  %v814_v56 = vsel %vm16_vm1, %v791_v24, 0.0  ;;  %v816_v10 = vsel %vm16_vm1, %v792_v59, 0.0 }
 0x1ad   :  { %v815_v43 = vadd.f32 %v814_v56, %v813_v41 }
 0x1ae   :  { %775 = vst.msk [vmem:[#allocation2 + $0x58] sm:$0xff] %vm16_vm1, %v758_v1 }
 0x1af   :  { %v740_v5 = vpop.xlane.xlu0 %739  ;;  %v793_v32 = vld [vmem:[#allocation2 + $0x50] sm:$0xff]  ;;  %v817_v16 = vadd.f32 %v816_v10, %v815_v43 }
 0x1b0   :  { %v759_v55 = vadd.f32 %v740_v5, %v711_v3  ;;  %v818_v15 = vsel %vm16_vm1, %v793_v32, 0.0 }
 0x1b1   :  { %v819_v31 = vadd.f32 %v818_v15, %v817_v16 }
 0x1b2   :  { %776 = vst.msk [vmem:[#allocation2 + $0x60] sm:$0xff] %vm16_vm1, %v759_v55 }
 0x1b5   :  { %v742_v33 = vpop.xlane.xlu1 %741  ;;  %v794_v20 = vld [vmem:[#allocation2 + $0x58] sm:$0xff] }
 0x1b6   :  { %v760_v50 = vadd.f32 %v742_v33, %v712_v21  ;;  %v820_v29 = vsel %vm16_vm1, %v794_v20, 0.0 }
 0x1b7   :  { %v821_v60 = vadd.f32 %v820_v29, %v819_v31 }
 0x1b8   :  { %777 = vst.msk [vmem:[#allocation2 + $0x68] sm:$0xff] %vm16_vm1, %v760_v50 }
 0x1b9   :  { %v795_v58 = vld [vmem:[#allocation2 + $0x60] sm:$0xff] }
 0x1ba   :  { %v822_v8 = vsel %vm16_vm1, %v795_v58, 0.0 }
 0x1bb   :  { %v823_v44 = vadd.f32 %v822_v8, %v821_v60 }
 0x1bd   :  { %v744_v9 = vpop.xlane.xlu0 %743 }
 0x1be   :  { %v761_v35 = vadd.f32 %v744_v9, %v713_v36 }
 0x1bf   :  { %v796_v7 = vld [vmem:[#allocation2 + $0x68] sm:$0xff] }
 0x1c0   :  { %778 = vst.msk [vmem:[#allocation2 + $0x70] sm:$0xff] %vm16_vm1, %v761_v35  ;;  %v824_v27 = vsel %vm16_vm1, %v796_v7, 0.0 }
 0x1c1   :  { %v746_v62 = vpop.xlane.xlu1 %745  ;;  %v825_v14 = vadd.f32 %v824_v27, %v823_v44 }
 0x1c2   :  { %v762_v6 = vadd.f32 %v746_v62, %v714_v23 }
 0x1c4   :  { %779 = vst.msk [vmem:[#allocation2 + $0x78] sm:$0xff] %vm16_vm1, %v762_v6 }
 0x1c7   :  { %v797_v47 = vld [vmem:[#allocation2 + $0x70] sm:$0xff] }
 0x1c8   :  { %v826_v45 = vsel %vm16_vm1, %v797_v47, 0.0 }
 0x1c9   :  { %v827_v39 = vadd.f32 %v826_v45, %v825_v14 }
 0x1cb   :  { %v798_v53 = vld [vmem:[#allocation2 + $0x78] sm:$0xff] }
 0x1cc   :  { %v828_v42 = vsel %vm16_vm1, %v798_v53, 0.0 }
 0x1cd   :  { %v829_v48 = vadd.f32 %v828_v42, %v827_v39 }
 0x1cf   :  { %830 = vadd.xlane.f32.xlu0 %v829_v48 }
 0x25c   :  { %v831_v52 = vpop.xlane.xlu0 %830 }
 0x25d   :  { %v832_v17 = vrot.slane %v831_v52, 4 }
 0x25f   :  { %v833_v0 = vadd.f32 %v832_v17, %v831_v52 }
 0x261   :  { %v834_v22 = vrot.slane %v833_v0, 2 }
 0x263   :  { %v835_v12 = vadd.f32 %v834_v22, %v833_v0 }
 0x265   :  { %v836_v61 = vrot.slane %v835_v12, 1 }
 0x267   :  { %v837_v46 = vadd.f32 %v836_v61, %v835_v12 }
 0x269   :  { %861 = vpush %v837_v46 }
 0x29a   :  { %s862_s18 = spop %861 }
 0x29b   :  { %v842_v54 = vstv %s862_s18 }
 0x29c   :  { %v843_v57 = vsel %vm841_vm2, %v842_v54, 0.0 }
 0x29d   :  { %844 = vst [vmem:[#allocation3] sm:$0x1] %v843_v57 }
 0x29e   :  { %953 = shalt.err (!%p950_p4)
}
 0x29f   :  { %s954_s23 = scalar_lea.hbm %s1571_s2, 16 }
 0x2a0   :  { %p955_p5 = scmp.ne.s32.totalorder %s1571_s2, %s954_s23  ;;  %p958_p6 = scmp.lt.u32.totalorder %s954_s23, %s1571_s2 }
 0x2a2   :  { %p960_p7 = pnand %p958_p6, %p955_p5 }
 0x2a4   :  { %963 = shalt.err (!%p960_p7)
}
 0x2a5   :  { %854 = dma.vmem_to_hbm [thread:$0]  %s852_s17, 16, %s1571_s2, [#allocation4]  }
 0x2a6   :  { %964 = dma.done.wait [#allocation4], 16  }
 0x2a7   :  { %965 = vsyncadd [#allocation4], 4294967280 }
 0x2a8   :  { %858 = vsyncpa [#allocation4], 1 }

</bundles_post_ra>
